<compile_context>
chip_gen: v7x
topology: tpu7x:2x2x1
jax: 0.10.0
libtpu: 0.0.40
codegen_flags: <defaults>
</compile_context>

<pallas_src>
import jax
import jax.numpy as jnp
from jax.experimental import pallas as pl
from jax.experimental.pallas import tpu as pltpu


# ------------------------------ Pallas kernel -------------------------------

def _cross_attn_kernel(x_ref, philr_ref, p_ref, wth_ref, wps_ref,
                       bcomb_ref, bps_ref, o_ref, phihr_ref):
    m = pl.program_id(1)
    tm = x_ref.shape[-1]

    @pl.when(m == 0)
    def _():
        # Once per image: upsample the (hoisted) phi(g) activation to full
        # resolution via the per-image interpolation matrix.
        # (C, Mg) f32 @ (Mg, Mx_pad) f32 -> (C, Mx_pad) f32 (kept in f32 for
        # interpolation accuracy).
        phihr_ref[...] = jnp.dot(philr_ref[...], p_ref[...],
                                 preferred_element_type=jnp.float32)

    # theta 1x1 conv on this spatial tile (bf16 MXU operands, f32 accumulate)
    theta = jnp.dot(wth_ref[...], x_ref[...],
                    preferred_element_type=jnp.float32)

    # f = relu(theta + phi_hr + (b_theta + b_phi))  -- single folded bias add
    col0 = pl.multiple_of(m * tm, 128)
    f = jnp.maximum(theta + phihr_ref[:, pl.ds(col0, tm)] + bcomb_ref[...], 0.0)

    # psi 1x1 conv (Cout = 1): broadcast-mul + sublane reduce, f32 epilogue
    psi = jnp.sum(wps_ref[...] * f, axis=0, keepdims=True) + bps_ref[...]
    o_ref[...] = jax.nn.sigmoid(psi)


# --------------------------- interpolation matrix ---------------------------

def _interp_1d_matrix(out_n, in_n):
    """(out_n, in_n) bilinear align_corners=True interpolation weights."""
    if out_n == 1 or in_n == 1:
        src = jnp.zeros((out_n,), jnp.float32)
    else:
        src = jnp.arange(out_n, dtype=jnp.float32) * ((in_n - 1) / (out_n - 1))
    p0 = jnp.clip(jnp.floor(src), 0, in_n - 1).astype(jnp.int32)
    p1 = jnp.clip(p0 + 1, 0, in_n - 1)
    w = src - p0.astype(jnp.float32)
    eye = jnp.eye(in_n, dtype=jnp.float32)
    return eye[p0] * (1.0 - w)[:, None] + eye[p1] * w[:, None]


def _build_upsample_matrix(hg, wg, hx, wx):
    """Per-image P of shape (Hg*Wg, Hx*Wx): phi_hr_flat = phi_lr_flat @ P."""
    ry = _interp_1d_matrix(hx, hg)                  # (hx, hg)
    rx = _interp_1d_matrix(wx, wg)                  # (wx, wg)
    return jnp.kron(ry.T, rx.T)                     # (hg*wg, hx*wx)


# ------------------------------ tiling planner -------------------------------

def _vmem_bytes(tm, mx_pad, c, mg):
    return (2 * c * tm * 2            # x tile, double buffered, bf16
            + 2 * 1 * tm * 4          # out tile, double buffered, f32
            + 2 * c * mg * 4          # phi_lr block, f32
            + 2 * mg * mx_pad * 4     # per-image P, f32
            + c * mx_pad * 4          # phi_hr scratch, f32
            + 3 * c * tm * 4          # live f32 intermediates (theta, f, psi)
            + 2 * (c * c * 2 + 4 * c * 4)  # weights / biases
            + (64 << 10))             # slack


def _plan_tiling(mx, c, mg, budget=24 << 20):
    """Largest lane tile (multiple of 128) that fits a conservative VMEM
    budget (works on v7x's 64 MiB physical VMEM); no forced >=2 spatial
    blocks — the batch grid axis supplies megacore parallelism."""
    m128 = -(-mx // 128) * 128
    tm = 128
    for cand in (4096, 2048, 1024, 512, 256, 128):
        if cand > m128:
            continue
        mx_pad_c = -(-mx // cand) * cand
        if _vmem_bytes(cand, mx_pad_c, c, mg) <= budget:
            tm = cand
            break
    mx_pad = -(-mx // tm) * tm
    need = _vmem_bytes(tm, mx_pad, c, mg)
    vmem_limit = int(min(max(2 * need, 32 << 20), 48 << 20))
    return tm, mx_pad, vmem_limit


# ------------------------------ module forward ------------------------------

def cross_attention_block(params, x, g):
    """Fused CrossAttentionBlock forward.  x:(N,C,Hx,Wx), g:(N,C,Hg,Wg)."""
    n, c, hx, wx = x.shape
    ng, cg, hg, wg = g.shape
    assert n == ng and c == cg

    mx, mg = hx * wx, hg * wg
    tm, mx_pad, vmem_limit = _plan_tiling(mx, c, mg)
    n_m = mx_pad // tm

    # Free views (no HBM transpose pass); x goes to bf16 for the MXU.
    x3 = x.reshape(n, c, mx).astype(jnp.bfloat16)
    if mx_pad != mx:
        x3 = jnp.pad(x3, ((0, 0), (0, 0), (0, mx_pad - mx)))

    # Per-image bilinear align_corners matrix, f32, zero-padded extra columns.
    p_img = _build_upsample_matrix(hg, wg, hx, wx)
    if mx_pad != mx:
        p_img = jnp.pad(p_img, ((0, 0), (0, mx_pad - mx)))

    # Hoisted phi 1x1 conv (tiny matmul in XLA); its bias is folded into the
    # epilogue bias since every interpolation column sums to 1.
    phi_lr = jnp.einsum('oc,ncm->nom', params["w_phi"].astype(jnp.float32),
                        g.reshape(n, c, mg).astype(jnp.float32))

    b_comb = (params["b_theta"] + params["b_phi"]).reshape(c, 1).astype(jnp.float32)

    out = pl.pallas_call(
        _cross_attn_kernel,
        out_shape=jax.ShapeDtypeStruct((n, 1, mx_pad), jnp.float32),
        grid=(n, n_m),
        in_specs=[
            pl.BlockSpec((None, c, tm), lambda b, m: (b, 0, m)),    # x tile
            pl.BlockSpec((None, c, mg), lambda b, m: (b, 0, 0)),    # phi_lr (per image)
            pl.BlockSpec((mg, mx_pad), lambda b, m: (0, 0)),        # P (fetched once)
            pl.BlockSpec((c, c), lambda b, m: (0, 0)),              # w_theta
            pl.BlockSpec((c, 1), lambda b, m: (0, 0)),              # w_psi (column)
            pl.BlockSpec((c, 1), lambda b, m: (0, 0)),              # b_theta + b_phi
            pl.BlockSpec((1, 1), lambda b, m: (0, 0)),              # b_psi
        ],
        out_specs=pl.BlockSpec((None, 1, tm), lambda b, m: (b, 0, m)),
        scratch_shapes=[pltpu.VMEM((c, mx_pad), jnp.float32)],      # phi_hr (per image)
        compiler_params=pltpu.CompilerParams(
            dimension_semantics=("parallel", "arbitrary"),
            vmem_limit_bytes=vmem_limit),
    )(
        x3,
        phi_lr,
        p_img,
        params["w_theta"].astype(jnp.bfloat16),
        params["w_psi"].reshape(c, 1).astype(jnp.float32),
        b_comb,
        params["b_psi"].reshape(1, 1).astype(jnp.float32),
    )

    return out[:, :, :mx].reshape(n, 1, hx, wx)                     # (N,1,Hx,Wx)


# ------------------------- parameters (folded BN) ----------------------------

def _fold_bn(w, b, gamma, beta, mean, var, eps=1e-5):
    s = gamma / jnp.sqrt(var + eps)
    return w * s[:, None], (b - mean) * s + beta


def init_cross_attention(key, c):
    ks = jax.random.split(key, 6)

    def conv(k, cout, cin, scale=0.2):
        kw, kb = jax.random.split(k)
        w = scale * jax.random.normal(kw, (cout, cin), jnp.float32)
        b = scale * jax.random.normal(kb, (cout,), jnp.float32)
        return w, b

    def bn(k, cn):
        k1, k2, k3, k4 = jax.random.split(k, 4)
        gamma = 1.0 + 0.1 * jax.random.normal(k1, (cn,), jnp.float32)
        beta = 0.05 * jax.random.normal(k2, (cn,), jnp.float32)
        mean = 0.05 * jax.random.normal(k3, (cn,), jnp.float32)
        var = 1.0 + 0.1 * jnp.abs(jax.random.normal(k4, (cn,), jnp.float32))
        return gamma, beta, mean, var

    w_t, b_t = _fold_bn(*conv(ks[0], c, c), *bn(ks[1], c))
    w_p, b_p = _fold_bn(*conv(ks[2], c, c), *bn(ks[3], c))
    w_s, b_s = _fold_bn(*conv(ks[4], 1, c), *bn(ks[5], 1))
    return {"w_theta": w_t, "b_theta": b_t,
            "w_phi": w_p, "b_phi": b_p,
            "w_psi": w_s, "b_psi": b_s}


# ------------------------------ pure-JAX reference ---------------------------

def _bilinear_ac_ref(x, oh, ow):
    n, c, h, w = x.shape
    if (oh, ow) == (h, w):
        return x

    def coords(out, inn):
        if out == 1 or inn == 1:
            return jnp.zeros((out,), jnp.float32)
        return jnp.arange(out, dtype=jnp.float32) * ((inn - 1) / (out - 1))

    ys, xs = coords(oh, h), coords(ow, w)
    y0 = jnp.clip(jnp.floor(ys), 0, h - 1).astype(jnp.int32)
    y1 = jnp.clip(y0 + 1, 0, h - 1)
    x0 = jnp.clip(jnp.floor(xs), 0, w - 1).astype(jnp.int32)
    x1 = jnp.clip(x0 + 1, 0, w - 1)
    wy = (ys - y0.astype(jnp.float32)).reshape(1, 1, oh, 1)
    wx = (xs - x0.astype(jnp.float32)).reshape(1, 1, 1, ow)
    a = x[:, :, y0][:, :, :, x0]
    b = x[:, :, y0][:, :, :, x1]
    cc = x[:, :, y1][:, :, :, x0]
    d = x[:, :, y1][:, :, :, x1]
    return (a * (1 - wy) * (1 - wx) + b * (1 - wy) * wx
            + cc * wy * (1 - wx) + d * wy * wx)


def cross_attention_ref(params, x, g):
    theta = (jnp.einsum('oc,nchw->nohw', params["w_theta"], x)
             + params["b_theta"][None, :, None, None])
    phi = (jnp.einsum('oc,nchw->nohw', params["w_phi"], g)
           + params["b_phi"][None, :, None, None])
    phi = _bilinear_ac_ref(phi, x.shape[2], x.shape[3])
    f = jnp.maximum(theta + phi, 0.0)
    psi = (jnp.einsum('oc,nchw->nohw', params["w_psi"], f)
           + params["b_psi"][None, :, None, None])
    return jax.nn.sigmoid(psi)


# ---------------------------------- main -------------------------------------

if __name__ == "__main__":
    N, C = 2, 32
    Hx = Wx = 16          # x spatial size
    Hg = Wg = 8           # gate spatial size (upsampled inside the kernel)

    key = jax.random.PRNGKey(0)
    kp, kx, kg = jax.random.split(key, 3)
    params = init_cross_attention(kp, C)
    x = jax.random.normal(kx, (N, C, Hx, Wx), jnp.float32)
    g = jax.random.normal(kg, (N, C, Hg, Wg), jnp.float32)

    fwd = jax.jit(cross_attention_block)
    out = fwd(params, x, g)
    jax.block_until_ready(out)

    assert out.shape == (N, 1, Hx, Wx)
    assert bool(jnp.all(jnp.isfinite(out)))

    ref = cross_attention_ref(params, x, g)
    max_err = float(jnp.max(jnp.abs(out - ref)))
    assert max_err < 5e-2, f"max abs err vs reference: {max_err}"

    print("KERNEL_OK")
</pallas_src>

<mosaic_0001>
module attributes {stable_mosaic.version = 11 : i64} {
  func.func @_cross_attn_kernel(%arg0: i32, %arg1: i32, %arg2: memref<1x32x256xbf16, #tpu.memory_space<vmem>>, %arg3: memref<1x32x64xf32, #tpu.memory_space<vmem>>, %arg4: memref<64x256xf32, #tpu.memory_space<vmem>>, %arg5: memref<32x32xbf16, #tpu.memory_space<vmem>>, %arg6: memref<32x1xf32, #tpu.memory_space<vmem>>, %arg7: memref<32x1xf32, #tpu.memory_space<vmem>>, %arg8: memref<1x1xf32, #tpu.memory_space<vmem>>, %arg9: memref<1x1x256xf32, #tpu.memory_space<vmem>>, %arg10: memref<32x256xf32, #tpu.memory_space<vmem>>) attributes {dimension_semantics = [#tpu.dimension_semantics<parallel>, #tpu.dimension_semantics<arbitrary>], iteration_bounds = array<i64: 2, 1>, scalar_prefetch = 0 : i64, scratch_operands = 1 : i64, tpu.core_type = #tpu.core_type<tc>, window_params = [{transform_indices = @transform_0, window_bounds = array<i64: 1, 32, 256>}, {transform_indices = @transform_1, window_bounds = array<i64: 1, 32, 64>}, {pipeline_mode = #tpu.pipeline_mode<synchronous>, transform_indices = @transform_2, window_bounds = array<i64: 64, 256>}, {pipeline_mode = #tpu.pipeline_mode<synchronous>, transform_indices = @transform_3, window_bounds = array<i64: 32, 32>}, {pipeline_mode = #tpu.pipeline_mode<synchronous>, transform_indices = @transform_4, window_bounds = array<i64: 32, 1>}, {pipeline_mode = #tpu.pipeline_mode<synchronous>, transform_indices = @transform_5, window_bounds = array<i64: 32, 1>}, {pipeline_mode = #tpu.pipeline_mode<synchronous>, transform_indices = @transform_6, window_bounds = array<i64: 1, 1>}, {transform_indices = @transform_7, window_bounds = array<i64: 1, 1, 256>}]} {
    %c0_i32 = arith.constant 0 : i32
    %0 = arith.cmpi eq, %arg1, %c0_i32 : i32
    %1 = arith.extui %0 : i1 to i32
    %c0_i32_0 = arith.constant 0 : i32
    %2 = arith.cmpi ne, %1, %c0_i32_0 : i32
    scf.if %2 {
      %c0_18 = arith.constant 0 : index
      %c0_19 = arith.constant 0 : index
      %c0_20 = arith.constant 0 : index
      %33 = vector.load %arg3[%c0_18, %c0_19, %c0_20] : memref<1x32x64xf32, #tpu.memory_space<vmem>>, vector<1x32x64xf32>
      %34 = vector.shape_cast %33 : vector<1x32x64xf32> to vector<32x64xf32>
      %c0_21 = arith.constant 0 : index
      %c0_22 = arith.constant 0 : index
      %35 = vector.load %arg4[%c0_21, %c0_22] : memref<64x256xf32, #tpu.memory_space<vmem>>, vector<64x256xf32>
      %cst_23 = arith.constant dense<0.000000e+00> : vector<32x256xf32>
      %36 = tpu.matmul %34, %35, %cst_23 {dimension_numbers = #tpu.dot_dimension_numbers<[1], [0], [0], [1], [0, 0, 1, 1], [], []>} : vector<32x64xf32>, vector<64x256xf32>, vector<32x256xf32> -> vector<32x256xf32>
      %c0_24 = arith.constant 0 : index
      %c0_25 = arith.constant 0 : index
      %37 = vector.load %arg10[%c0_24, %c0_25] : memref<32x256xf32, #tpu.memory_space<vmem>>, vector<32x256xf32>
      tpu.vector_store %arg10[%c0_24, %c0_25], %36 {strides = array<i32>} : memref<32x256xf32, #tpu.memory_space<vmem>>, vector<32x256xf32>,
    } else {
    }
    %c0 = arith.constant 0 : index
    %c0_1 = arith.constant 0 : index
    %3 = vector.load %arg5[%c0, %c0_1] : memref<32x32xbf16, #tpu.memory_space<vmem>>, vector<32x32xbf16>
    %c0_2 = arith.constant 0 : index
    %c0_3 = arith.constant 0 : index
    %c0_4 = arith.constant 0 : index
    %4 = vector.load %arg2[%c0_2, %c0_3, %c0_4] : memref<1x32x256xbf16, #tpu.memory_space<vmem>>, vector<1x32x256xbf16>
    %5 = vector.shape_cast %4 : vector<1x32x256xbf16> to vector<32x256xbf16>
    %cst = arith.constant dense<0.000000e+00> : vector<32x256xf32>
    %6 = tpu.matmul %3, %5, %cst {dimension_numbers = #tpu.dot_dimension_numbers<[1], [0], [0], [1], [0, 0, 1, 1], [], []>} : vector<32x32xbf16>, vector<32x256xbf16>, vector<32x256xf32> -> vector<32x256xf32>
    %c256_i32 = arith.constant 256 : i32
    %7 = arith.muli %arg1, %c256_i32 : i32
    %8 = tpu.assume_multiple %7, 128 : i32
    %c0_5 = arith.constant 0 : index
    %9 = arith.index_cast %8 : i32 to index
    %10 = vector.load %arg10[%c0_5, %9] : memref<32x256xf32, #tpu.memory_space<vmem>>, vector<32x256xf32>
    %11 = arith.addf %6, %10 : vector<32x256xf32>
    %c0_6 = arith.constant 0 : index
    %c0_7 = arith.constant 0 : index
    %12 = vector.load %arg7[%c0_6, %c0_7] : memref<32x1xf32, #tpu.memory_space<vmem>>, vector<32x1xf32>
    %13 = vector.broadcast %12 : vector<32x1xf32> to vector<32x256xf32>
    %14 = arith.addf %11, %13 : vector<32x256xf32>
    %cst_8 = arith.constant 0.000000e+00 : f32
    %15 = vector.broadcast %cst_8 : f32 to vector<32x256xf32>
    %16 = arith.maximumf %14, %15 : vector<32x256xf32>
    %c0_9 = arith.constant 0 : index
    %c0_10 = arith.constant 0 : index
    %17 = vector.load %arg6[%c0_9, %c0_10] : memref<32x1xf32, #tpu.memory_space<vmem>>, vector<32x1xf32>
    %18 = vector.broadcast %17 : vector<32x1xf32> to vector<32x256xf32>
    %19 = arith.mulf %18, %16 : vector<32x256xf32>
    %cst_11 = arith.constant dense<0.000000e+00> : vector<256xf32>
    %20 = vector.multi_reduction <add>, %19, %cst_11 [0] : vector<32x256xf32> to vector<256xf32>
    %21 = vector.shape_cast %20 : vector<256xf32> to vector<1x256xf32>
    %c0_12 = arith.constant 0 : index
    %c0_13 = arith.constant 0 : index
    %22 = vector.load %arg8[%c0_12, %c0_13] : memref<1x1xf32, #tpu.memory_space<vmem>>, vector<1x1xf32>
    %23 = vector.broadcast %22 : vector<1x1xf32> to vector<1x256xf32>
    %24 = arith.addf %21, %23 : vector<1x256xf32>
    %25 = arith.negf %24 : vector<1x256xf32>
    %26 = math.exp %25 : vector<1x256xf32>
    %cst_14 = arith.constant 1.000000e+00 : f32
    %27 = vector.broadcast %cst_14 : f32 to vector<1x256xf32>
    %28 = arith.addf %27, %26 : vector<1x256xf32>
    %29 = arith.divf %27, %28 : vector<1x256xf32>
    %c0_15 = arith.constant 0 : index
    %c0_16 = arith.constant 0 : index
    %c0_17 = arith.constant 0 : index
    %30 = vector.load %arg9[%c0_15, %c0_16, %c0_17] : memref<1x1x256xf32, #tpu.memory_space<vmem>>, vector<1x1x256xf32>
    %31 = vector.shape_cast %30 : vector<1x1x256xf32> to vector<1x256xf32>
    %32 = vector.shape_cast %29 : vector<1x256xf32> to vector<1x1x256xf32>
    tpu.vector_store %arg9[%c0_15, %c0_16, %c0_17], %32 {strides = array<i32>} : memref<1x1x256xf32, #tpu.memory_space<vmem>>, vector<1x1x256xf32>,
    return
  }
  func.func @transform_0(%arg0: i32, %arg1: i32) -> (i32, i32, i32) {
    %c0_i32 = arith.constant 0 : i32
    %c0_i32_0 = arith.constant 0 : i32
    return %arg0, %c0_i32, %arg1 : i32, i32, i32
  }
  func.func @transform_1(%arg0: i32, %arg1: i32) -> (i32, i32, i32) {
    %c0_i32 = arith.constant 0 : i32
    %c0_i32_0 = arith.constant 0 : i32
    %c0_i32_1 = arith.constant 0 : i32
    return %arg0, %c0_i32, %c0_i32_0 : i32, i32, i32
  }
  func.func @transform_2(%arg0: i32, %arg1: i32) -> (i32, i32) {
    %c0_i32 = arith.constant 0 : i32
    %c0_i32_0 = arith.constant 0 : i32
    %c0_i32_1 = arith.constant 0 : i32
    return %c0_i32, %c0_i32_0 : i32, i32
  }
  func.func @transform_3(%arg0: i32, %arg1: i32) -> (i32, i32) {
    %c0_i32 = arith.constant 0 : i32
    %c0_i32_0 = arith.constant 0 : i32
    %c0_i32_1 = arith.constant 0 : i32
    return %c0_i32, %c0_i32_0 : i32, i32
  }
  func.func @transform_4(%arg0: i32, %arg1: i32) -> (i32, i32) {
    %c0_i32 = arith.constant 0 : i32
    %c0_i32_0 = arith.constant 0 : i32
    %c0_i32_1 = arith.constant 0 : i32
    return %c0_i32, %c0_i32_0 : i32, i32
  }
  func.func @transform_5(%arg0: i32, %arg1: i32) -> (i32, i32) {
    %c0_i32 = arith.constant 0 : i32
    %c0_i32_0 = arith.constant 0 : i32
    %c0_i32_1 = arith.constant 0 : i32
    return %c0_i32, %c0_i32_0 : i32, i32
  }
  func.func @transform_6(%arg0: i32, %arg1: i32) -> (i32, i32) {
    %c0_i32 = arith.constant 0 : i32
    %c0_i32_0 = arith.constant 0 : i32
    %c0_i32_1 = arith.constant 0 : i32
    return %c0_i32, %c0_i32_0 : i32, i32
  }
  func.func @transform_7(%arg0: i32, %arg1: i32) -> (i32, i32, i32) {
    %c0_i32 = arith.constant 0 : i32
    %c0_i32_0 = arith.constant 0 : i32
    return %arg0, %c0_i32, %arg1 : i32, i32, i32
  }
}

</mosaic_0001>

<bundles_post_ra>
// kernel: cross_attention_block.1
= control target key start
LH: loop header
LB: loop body
LE: loop exit
PB: predicated region body
PF: predicated region fallthrough
CT: control target
= control target key end

     0   :  { %s975_s26 = smov 0   ;;  %s977_s27 = smov 0   ;;  %s1109_s0 = inlined_call_operand.vmem [shape: bf16[2,32,256], index: 0, kind: input, shape index: {}]   ;;  %s1110_s1 = inlined_call_operand.vmem [shape: f32[2,32,64], index: 1, kind: input, shape index: {}]   ;;  %s1111_s2 = inlined_call_operand.vmem [shape: f32[64,256], index: 2, kind: input, shape index: {}]   ;;  %s1112_s3 = inlined_call_operand.vmem [shape: bf16[32,32], index: 3, kind: input, shape index: {}]   ;;  %s1113_s4 = inlined_call_operand.vmem [shape: f32[32,1], index: 4, kind: input, shape index: {}]   ;;  %s1114_s5 = inlined_call_operand.vmem [shape: f32[32,1], index: 5, kind: input, shape index: {}]   ;;  %s1115_s6 = inlined_call_operand.<no memory space> [shape: f32[1,1], index: 6, kind: input, shape index: {}]   ;;  %s1116_s7 = inlined_call_operand.vmem [shape: f32[2,1,256], index: 7, kind: output, shape index: {}]  }
   0x1   :  { %v12_v0 = vstv %s1115_s6  ;;  %s979_s28 = smov 0  }
   0x2   :  { %13 = vst [vmem:[#allocation3] sm:$0x1] %v12_v0 }
   0x3 LB: > { %s31_s6 = sadd.s32 1, %s923_s27  ;;  %p820_p0 = scmp.ge.s32.totalorder %s927_s28, 1  ;;  %s927_s28 = sphi %s979_s28, %s19_s28   ;;  %s923_s27 = sphi %s977_s27, %s1118_s27   ;;  %s919_s26 = sphi %s975_s26, %s1117_s26  }
   0x4   : > { %p33_p1 = scmp.ge.s32.totalorder %s31_s6, 2  ;;  %p270_p2 = scmp.lt.s32.totalorder %s927_s28, 3 }
   0x6   : > { %s1120_s6 = smov (%p33_p1, %s31_s6), 0  ;;  %p271_p3 = pnand %p820_p0, %p270_p2 }
   0x7   : > { %v348_v1 = vld [vmem:[%s1111_s2 + $0x8] sm:$0xff] (!%p271_p3)  ;;  %v350_v2 = vld [vmem:[%s1111_s2 + $0x18] sm:$0xff] (!%p271_p3)  ;;  %v347_v3 = vld [vmem:[%s1111_s2] sm:$0xff] (!%p271_p3)  ;;  %p315_p4 = scmp.lt.s32.totalorder (!%p271_p3), %s919_s26, 1  ;;  %v929_v8 = vmov (!%p271_p3), 0   ;;  %v930_v9 = vmov (!%p271_p3), 0.0  }
   0x8   : > { %274 = sbr.rel (%p271_p3) target bundleno = 308 (0x134), region = 48  ;;  %v844_v4 = vpack.c.bf16 (!%p271_p3), %v350_v2, %v348_v1  ;;  %v349_v5 = vld [vmem:[%s1111_s2 + $0x10] sm:$0xff] (!%p271_p3)  ;;  %v352_v6 = vld [vmem:[%s1111_s2 + $0x28] sm:$0xff] (!%p271_p3)  ;;  %v354_v7 = vld [vmem:[%s1111_s2 + $0x38] sm:$0xff] (!%p271_p3)  ;;  %563 = vmatprep.mubr.bf16.mxu1 (!%p271_p3), %v929_v8  ;;  %440 = vmatprep.mubr.f32.mxu0 (!%p271_p3), %v930_v9  ;;  %vm524_vm0 = vcmask (!%p271_p3), 261120   ;;  %vm363_vm1 = vcmask (!%p271_p3), 523264  }
   0x9   : > { %v846_v10 = vpack.c.bf16 (!%p271_p3), %v349_v5, %v347_v3  ;;  %v848_v11 = vpack.c.bf16 (!%p271_p3), %v354_v7, %v352_v6  ;;  %v351_v12 = vld [vmem:[%s1111_s2 + $0x20] sm:$0xff] (!%p271_p3)  ;;  %v353_v13 = vld [vmem:[%s1111_s2 + $0x30] sm:$0xff] (!%p271_p3)  ;;  %v356_v14 = vld [vmem:[%s1111_s2 + $0x48] sm:$0xff] (!%p271_p3)  ;;  %887 = vset.pattern.permute.xlu0 (!%p271_p3), %v929_v8  ;;  %888 = vset.pattern.permute.xlu1 (!%p271_p3), %v929_v8 }
   0xa   : > { %845 = vmatprep.subr.bf16.mxu0 (!%p271_p3), %v844_v4  ;;  %v358_v15 = vld [vmem:[%s1111_s2 + $0x58] sm:$0xff] (!%p271_p3)  ;;  %v850_v16 = vpack.c.bf16 (!%p271_p3), %v353_v13, %v351_v12  ;;  %v355_v17 = vld [vmem:[%s1111_s2 + $0x40] sm:$0xff] (!%p271_p3)  ;;  %v357_v18 = vld [vmem:[%s1111_s2 + $0x50] sm:$0xff] (!%p271_p3) }
   0xb   : > { %847 = vmatpush1.bf16.msra.mxu0 (!%p271_p3), %v846_v10  ;;  %v360_v19 = vld [vmem:[%s1111_s2 + $0x68] sm:$0xff] (!%p271_p3)  ;;  %v852_v20 = vpack.c.bf16 (!%p271_p3), %v358_v15, %v356_v14  ;;  %v362_v21 = vld [vmem:[%s1111_s2 + $0x78] sm:$0xff] (!%p271_p3)  ;;  %v854_v24 = vpack.c.bf16 (!%p271_p3), %v357_v18, %v355_v17  ;;  %v359_v26 = vld [vmem:[%s1111_s2 + $0x60] sm:$0xff] (!%p271_p3) }
   0xc   : > { %849 = vmatprep.subr.bf16.mxu0 (!%p271_p3), %v848_v11  ;;  %v856_v27 = vpack.c.bf16 (!%p271_p3), %v362_v21, %v360_v19  ;;  %v361_v29 = vld [vmem:[%s1111_s2 + $0x70] sm:$0xff] (!%p271_p3)  ;;  %v584_v30 = vld [vmem:[%s1114_s5] sm:$0xff] (!%p271_p3)  ;;  %v585_v34 = vld [vmem:[%s1114_s5 + $0x8] sm:$0xff] (!%p271_p3) }
   0xd   : > { %v858_v31 = vpack.c.bf16 (!%p271_p3), %v361_v29, %v359_v26  ;;  %v895_v32 = vld [vmem:[%s1112_s3] sm:$0xff] (!%p271_p3)   ;;  %590 = vperm.xlu0 (!%p271_p3), %887, %v584_v30   ;;  %v586_v33 = vld [vmem:[%s1114_s5 + $0x10] sm:$0xff] (!%p271_p3)  ;;  %v587_v35 = vld [vmem:[%s1114_s5 + $0x18] sm:$0xff] (!%p271_p3) }
   0xe   : > { %600 = vperm.xlu1 (!%p271_p3), %888, %v586_v33   ;;  %v624_v37 = vld [vmem:[%s1113_s4] sm:$0xff] (!%p271_p3)  ;;  %v625_v38 = vld [vmem:[%s1113_s4 + $0x8] sm:$0xff] (!%p271_p3)  ;;  %v626_v41 = vld [vmem:[%s1113_s4 + $0x10] sm:$0xff] (!%p271_p3) }
   0xf   : > { %s1122_s26 = smov (!%p315_p4, %s919_s26), 1  ;;  %851 = vmatpush1.bf16.msra.mxu0 %v850_v16  ;;  %v896_v40 = vld [vmem:[%s1112_s3 + $0x8] sm:$0xff]   ;;  %v627_v42 = vld [vmem:[%s1113_s4 + $0x18] sm:$0xff]  ;;  %v674_v44 = vld [vmem:[#allocation3] sm:$0x1] }
  0x10   : > { %s842_s29 = sshll.u32 %s1122_s26, 5  ;;  %853 = vmatprep.subr.bf16.mxu0 %v852_v20  ;;  %s825_s25 = sshll.u32 %s1122_s26, 1 }
  0x11   : > { %s322_s15 = scalar_lea.vmem %s1109_s0, %s842_s29  ;;  %s1060_s11 = scalar_lea.vmem %s1110_s1, %s842_s29  ;;  %595 = vperm.xlu0 %887, %v585_v34  }
  0x12   : > { %v889_v22 = vld [vmem:[%s322_s15 + $0x4] ss:$8 sps:$4 sm:$0xff]   ;;  %v891_v23 = vld [vmem:[%s322_s15] ss:$8 sps:$4 sm:$0xff]   ;;  %v892_v25 = vld [vmem:[%s322_s15 + $0x14] ss:$8 sps:$4 sm:$0xff]   ;;  %605 = vperm.xlu1 %888, %v587_v35   ;;  %s336_s9 = scalar_lea.vmem %s1116_s7, %s825_s25 }
  0x13   : > { %531 = vmatprep.subr.bf16.mxu1 %v889_v22  ;;  %v894_v28 = vld [vmem:[%s322_s15 + $0x10] ss:$8 sps:$4 sm:$0xff]   ;;  %855 = vmatpush1.bf16.msra.mxu0 %v854_v24  ;;  %v343_v36 = vld [vmem:[%s1060_s11] sm:$0xff]  ;;  %v344_v39 = vld [vmem:[%s1060_s11 + $0x8] sm:$0xff] }
  0x14   : > { %532 = vmatpush1.bf16.msra.mxu1 %v891_v23  ;;  %857 = vmatprep.subr.bf16.mxu0 %v856_v27  ;;  %v345_v43 = vld [vmem:[%s1060_s11 + $0x10] sm:$0xff]  ;;  %v346_v45 = vld [vmem:[%s1060_s11 + $0x18] sm:$0xff] }
  0x15   : > { %533 = vmatprep.subr.bf16.mxu1 %v892_v25  ;;  %630 = vperm.xlu0 %887, %v624_v37  }
  0x16   : > { %635 = vperm.xlu1 %888, %v625_v38  }
  0x17   : > { %859 = vmatpush1.bf16.msra.mxu0 %v858_v31 }
  0x18   : > { %534 = vmatpush1.bf16.msra.mxu1 %v894_v28 }
  0x19   : > { %640 = vperm.xlu0 %887, %v626_v41  }
  0x1a   : > { %826 = vmatmul.mubr.msk.f32.vlgmr.msra.gmra.mrb[0].mxu0 %vm363_vm1, %v343_v36  ;;  %645 = vperm.xlu1 %888, %v627_v42   ;;  %v680_v42 = vlaneseq }
  0x1b   : > { %836 = vmatmul.mubr.msk.bf16.vlgmr.msra.gmra.mrb[0].mxu1 %vm524_vm0, %v895_v32  ;;  %446 = vmatprep.mubr.f32.mxu0 %v930_v9 }
  0x1c   : > { %573 = vmatprep.mubr.bf16.mxu1 %v929_v8  ;;  %vm718_vm2 = vcmp.lt.s32.totalorder %v680_v42, 256 }
  0x1d   : > { %677 = vperm.xlu0 %887, %v674_v44  }
  0x1e   : > { %827 = vmatmul.mubr.msk.f32.gmra.mrb[2].mxu0 %vm363_vm1, %v344_v39 }
  0x1f   : > { %452 = vmatprep.mubr.f32.mxu0 %v930_v9 }
  0x22   : > { %828 = vmatmul.mubr.msk.f32.gmra.mrb[4].mxu0 %vm363_vm1, %v345_v43 }
  0x23   : > { %837 = vmatmul.mubr.msk.bf16.gmra.mrb[4].mxu1 %vm524_vm0, %v896_v40  ;;  %458 = vmatprep.mubr.f32.mxu0 %v930_v9 }
  0x26   : > { %829 = vmatmul.mubr.msk.f32.gmra.mrb[6].mxu0 %vm363_vm1, %v346_v45 }
  0x8c   : > { %v591_v46 = vpop.permute.xlu0 %590 }
  0x8d   : > { %v601_v48 = vpop.permute.xlu1 %600 }
  0x90   : > { %v596_v53 = vpop.permute.xlu0 %595 }
  0x91   : > { %v606_v58 = vpop.permute.xlu1 %605 }
  0x94   : > { %v631_v2 = vpop.permute.xlu0 %630 }
  0x95   : > { %v636_v13 = vpop.permute.xlu1 %635 }
  0x98   : > { %v641_v27 = vpop.permute.xlu0 %640 }
  0x99   : > { %v646_v37 = vpop.permute.xlu1 %645 }
  0xed   : > { %v442_v51 = vpop.f32.mrb[0].mxu0 }
  0xee   : > { %v565_v47 = vpop.f32.mrb[0].mxu1  ;;  %v444_v55 = vpop.f32.mrb[1].mxu0 }
  0xef   : > { %v567_v49 = vpop.f32.mrb[1].mxu1  ;;  %v566_v54 = vadd.f32 %v565_v47, %v442_v51  ;;  %v681_v47 = vshrl.u32 %v680_v42, 7 }
  0xf0   : > { %v569_v50 = vpop.f32.mrb[2].mxu1  ;;  %v568_v56 = vadd.f32 %v567_v49, %v444_v55 }
  0xf1   : > { %v571_v52 = vpop.f32.mrb[3].mxu1  ;;  %v608_v57 = vadd.f32 %v591_v46, %v566_v54  ;;  %v448_v60 = vpop.f32.mrb[2].mxu0 }
  0xf2   : > { %v609_v59 = vadd.f32 %v591_v46, %v568_v56  ;;  %v570_v61 = vadd.f32 %v569_v50, %v448_v60  ;;  %v450_v62 = vpop.f32.mrb[3].mxu0  ;;  %v678_v54 = vpop.permute.xlu0 %677 }
  0xf3   : > { %v572_v0 = vadd.f32 %v571_v52, %v450_v62  ;;  %v616_v3 = vmax.f32 %v608_v57, 0.0  ;;  %v682_v52 = vsub.s32 0, %v681_v47 }
  0xf4   : > { %v610_v4 = vadd.f32 %v596_v53, %v570_v61  ;;  %v617_v6 = vmax.f32 %v609_v59, 0.0 }
  0xf5   : > { %v611_v7 = vadd.f32 %v596_v53, %v572_v0  ;;  %v454_v8 = vpop.f32.mrb[4].mxu0  ;;  %v648_v16 = vmul.f32 %v631_v2, %v616_v3 }
  0xf6   : > { %v575_v63 = vpop.f32.mrb[4].mxu1  ;;  %v618_v10 = vmax.f32 %v610_v4, 0.0  ;;  %v456_v12 = vpop.f32.mrb[5].mxu0  ;;  %v649_v19 = vmul.f32 %v631_v2, %v617_v6 }
  0xf7   : > { %v577_v1 = vpop.f32.mrb[5].mxu1  ;;  %v576_v11 = vadd.f32 %v575_v63, %v454_v8  ;;  %v619_v14 = vmax.f32 %v611_v7, 0.0 }
  0xf8   : > { %v579_v5 = vpop.f32.mrb[6].mxu1  ;;  %v578_v15 = vadd.f32 %v577_v1, %v456_v12  ;;  %v650_v17 = vmul.f32 %v636_v13, %v618_v10 }
  0xf9   : > { %v581_v9 = vpop.f32.mrb[7].mxu1  ;;  %v612_v18 = vadd.f32 %v601_v48, %v576_v11  ;;  %v651_v20 = vmul.f32 %v636_v13, %v619_v14  ;;  %v460_v22 = vpop.f32.mrb[6].mxu0 }
  0xfa   : > { %v613_v21 = vadd.f32 %v601_v48, %v578_v15  ;;  %v656_v23 = vadd.f32 %v650_v17, %v648_v16  ;;  %v580_v25 = vadd.f32 %v579_v5, %v460_v22  ;;  %v462_v26 = vpop.f32.mrb[7].mxu0  ;;  %v931_v5 = vmov 1966171168  }
  0xfb   : > { %v620_v24 = vmax.f32 %v612_v18, 0.0  ;;  %v665_v28 = vadd.f32 %v651_v20, %v649_v19  ;;  %v582_v30 = vadd.f32 %v581_v9, %v462_v26  ;;  %v702_v6 = vunpack.c.l.s4 %v931_v5 }
  0xfc   : > { %v621_v29 = vmax.f32 %v613_v21, 0.0  ;;  %v614_v32 = vadd.f32 %v606_v58, %v580_v25 }
  0xfd   : > { %v652_v31 = vmul.f32 %v641_v27, %v620_v24  ;;  %v615_v34 = vadd.f32 %v606_v58, %v582_v30  ;;  %v683_v58 = vrot.slane %v678_v54, %v682_v52  ;;  %v703_v7 = vunpack.c.0.s8 %v702_v6 }
  0xfe   : > { %v653_v33 = vmul.f32 %v641_v27, %v621_v29  ;;  %v622_v36 = vmax.f32 %v614_v32, 0.0 }
  0xff   : > { %v657_v35 = vadd.f32 %v656_v23, %v652_v31  ;;  %v623_v39 = vmax.f32 %v615_v34, 0.0  ;;  %v706_v9 = vsub.s32 %v703_v7, %v681_v47 }
 0x100   : > { %v666_v38 = vadd.f32 %v665_v28, %v653_v33  ;;  %v654_v40 = vmul.f32 %v646_v37, %v622_v36 }
 0x101   : > { %v655_v41 = vmul.f32 %v646_v37, %v623_v39 }
 0x102   : > { %v658_v43 = vadd.f32 %v657_v35, %v654_v40 }
 0x103   : > { %v667_v44 = vadd.f32 %v666_v38, %v655_v41 }
 0x104   : > { %v659_v45 = vrot.slane %v658_v43, 4 }
 0x105   : > { %v668_v46 = vrot.slane %v667_v44, 4 }
 0x106   : > { %v660_v48 = vadd.f32 %v659_v45, %v658_v43 }
 0x107   : > { %v669_v49 = vadd.f32 %v668_v46, %v667_v44 }
 0x108   : > { %v661_v50 = vrot.slane %v660_v48, 2 }
 0x109   : > { %v670_v51 = vrot.slane %v669_v49, 2 }
 0x10a   : > { %v662_v53 = vadd.f32 %v661_v50, %v660_v48 }
 0x10b   : > { %v671_v55 = vadd.f32 %v670_v51, %v669_v49 }
 0x10c   : > { %v663_v56 = vrot.slane %v662_v53, 1 }
 0x10d   : > { %v672_v57 = vrot.slane %v671_v55, 1 }
 0x10e   : > { %v664_v59 = vadd.f32 %v663_v56, %v662_v53 }
 0x10f   : > { %v673_v60 = vadd.f32 %v672_v57, %v671_v55 }
 0x110   : > { %v684_v61 = vadd.f32 %v683_v58, %v664_v59 }
 0x111   : > { %v685_v62 = vadd.f32 %v683_v58, %v673_v60 }
 0x112   : > { %v838_v63 = vmul.f32 -1.442695, %v684_v61 }
 0x113   : > { %v839_v0 = vmul.f32 -1.442695, %v685_v62 }
 0x114   : > { %897 = vpow2.f32 %v838_v63 }
 0x115   : > { %899 = vpow2.f32 %v839_v0 }
 0x11e   : > { %v898_v1 = vpop.eup %897 }
 0x11f   : > { %v900_v2 = vpop.eup %899  ;;  %v692_v3 = vadd.f32 1.0, %v898_v1 }
 0x120   : > { %v693_v4 = vadd.f32 1.0, %v900_v2 }
 0x121   : > { %901 = vrcp.f32 %v692_v3 }
 0x122   : > { %903 = vrcp.f32 %v693_v4 }
 0x12b   : > { %v902_v8 = vpop.eup %901 }
 0x12c   : > { %v904_v10 = vpop.eup %903 }
 0x12d   : > { %v700_v11 = vcombine.low %v902_v8, %v904_v10 }
 0x12f   : > { %v707_v12 = vrot.slane %v700_v11, %v706_v9 }
 0x131   : > { %v714_v13 = vrot.slane %v707_v12, %v706_v9 }
 0x133   : > { %720 = vst.msk [vmem:[%s336_s9] sm:$0x3] %vm718_vm2, %v714_v13 }
 0x134 PF: > { %s19_s28 = sadd.s32 1, %s927_s28   ;;  %s1117_s26 = smov %s923_s27 }
 0x135   : > { %p16_p5 = scmp.ge.s32.totalorder %s19_s28, 4   ;;  %s1118_s27 = smov %s1120_s6 }
 0x137   :  { %18 = sbr.rel (!%p16_p5) target bundleno = 3 (0x3), region = 86 }

</bundles_post_ra>
